<compile_context>
chip_gen: v6e
topology: v6e:2x2x1
jax: 0.10.0
libtpu: 0.0.40
codegen_flags: <defaults>
</compile_context>

<pallas_src>
import math

import jax
import jax.numpy as jnp
import numpy as np
from jax.experimental import pallas as pl
from jax.experimental.pallas import tpu as pltpu

HIDDEN_DIMS = (256, 512, 256, 128, 64)
_LANE = 128


def _round_up(n, m):
    return ((n + m - 1) // m) * m


# -----------------------------------------------------------------------------
# Parameters (PyTorch nn.Linear-style init, stored (in, out) so kernel does h@W)
# -----------------------------------------------------------------------------
def init_fc_generator_params(key, input_dim, output_dim, dtype=jnp.float32):
    dims = (input_dim,) + HIDDEN_DIMS + (output_dim,)
    params = []
    for i in range(len(dims) - 1):
        fan_in, fan_out = dims[i], dims[i + 1]
        key, kw, kb = jax.random.split(key, 3)
        bound = 1.0 / math.sqrt(fan_in)
        w = jax.random.uniform(kw, (fan_in, fan_out), dtype, -bound, bound)
        b = jax.random.uniform(kb, (fan_out,), dtype, -bound, bound)
        params.append((w, b))
    return params


def pack_fc_generator_params(params):
    """Pad every layer output (and matching next-layer input) up to a multiple
    of 128 lanes, cast weights to bf16, and concatenate all biases (kept f32)
    into a single lane-aligned (1, sum) row."""
    in_dims = [w.shape[0] for w, _ in params]
    out_dims = [w.shape[1] for w, _ in params]
    out_pads = [_round_up(d, _LANE) for d in out_dims]
    in_pads = [in_dims[0]] + out_pads[:-1]

    ws, bs = [], []
    for i, (w, b) in enumerate(params):
        wp = jnp.zeros((in_pads[i], out_pads[i]), jnp.float32)
        wp = wp.at[: w.shape[0], : w.shape[1]].set(w)
        ws.append(wp.astype(jnp.bfloat16))
        bp = jnp.zeros((out_pads[i],), jnp.float32).at[: b.shape[0]].set(b)
        bs.append(bp)
    b_all = jnp.concatenate(bs)[None, :]  # (1, sum(out_pads)) f32
    return tuple(ws), b_all, tuple(out_pads), tuple(in_pads)


# -----------------------------------------------------------------------------
# Kernel
# -----------------------------------------------------------------------------
def _build_fc_kernel(bias_offsets, bias_widths):
    o1, o2, o3, o4, o5, o6 = bias_offsets
    n1, n2, n3, n4, n5, n6 = bias_widths

    def kernel(x_ref, w1, w2, w3, w4, w5, w6, b_ref, o_ref):
        def lin(h_bf16, w_ref, off, width):
            # bf16 operands into the MXU, f32 accumulation, f32 bias add.
            y = jnp.dot(h_bf16, w_ref[...], preferred_element_type=jnp.float32)
            return y + b_ref[:, off:off + width]

        def relu_bf16(y):
            # ReLU in f32, then materialize the activation once in bf16
            # (identical numerics to casting at the next matmul's input,
            # half the VMEM/vreg bytes for the big (tm, 512) intermediates).
            return jnp.maximum(y, 0.0).astype(jnp.bfloat16)

        h = x_ref[...].astype(jnp.bfloat16)         # (tm, in_dim)
        h = relu_bf16(lin(h, w1, o1, n1))
        h = relu_bf16(lin(h, w2, o2, n2))
        h = relu_bf16(lin(h, w3, o3, n3))
        h = relu_bf16(lin(h, w4, o4, n4))
        h = relu_bf16(lin(h, w5, o5, n5))
        out = lin(h, w6, o6, n6)                    # final linear, no ReLU
        # TODO(synk): `self.transform` is undefined in the source module; MisGAN
        # generators conventionally apply a sigmoid output transform, used here.
        o_ref[...] = jax.nn.sigmoid(out).astype(o_ref.dtype)

    return kernel


def _resident_spec(shape):
    """Grid-invariant operand: constant block index, single-buffered so the
    default 2-deep pipeline doesn't reserve a second copy in VMEM."""
    try:
        return pl.BlockSpec(shape, lambda i: (0, 0), pipeline_mode=pl.Buffered(1))
    except TypeError:  # older BlockSpec signature without pipeline_mode
        return pl.BlockSpec(shape, lambda i: (0, 0))


# -----------------------------------------------------------------------------
# Wrapper
# -----------------------------------------------------------------------------
def fc_generator_forward(x, params, *, tile_m=1024):
    """x: (B, input_dim) f32 -> (B, output_dim) f32."""
    B, in_dim = x.shape
    output_dim = params[-1][0].shape[1]

    ws, b_all, out_pads, in_pads = pack_fc_generator_params(params)
    out_pad = out_pads[-1]

    # Batch tile: multiple of 8 sublanes, capped at tile_m.  If that collapses
    # the grid to a single step, halve the tile (when the batch allows) so
    # v7x's two TensorCores both get work under dimension_semantics=parallel.
    tm = min(tile_m, _round_up(B, 8))
    if _round_up(B, tm) // tm < 2 and B > 8:
        tm = min(tm, _round_up((B + 1) // 2, 8))
    assert tm % 8 == 0
    Bp = _round_up(B, tm)
    xp = jnp.pad(x, ((0, Bp - B), (0, 0))) if Bp != B else x

    bias_offsets = (0,) + tuple(int(v) for v in np.cumsum(out_pads[:-1]))
    kernel = _build_fc_kernel(bias_offsets, out_pads)

    # Weights/biases: full blocks, constant block index -> resident in VMEM
    # across grid steps (single DMA each), single-buffered.
    w_specs = [_resident_spec(w.shape) for w in ws]

    flops = 2 * Bp * sum(ki * no for ki, no in zip(in_pads, out_pads))
    bytes_accessed = (xp.size * 4                      # f32 input
                      + sum(w.size for w in ws) * 2    # bf16 weights
                      + b_all.size * 4                 # f32 biases
                      + Bp * out_pad * 2)              # bf16 output
    cost = pl.CostEstimate(flops=flops,
                           transcendentals=Bp * out_pad,  # sigmoid exps
                           bytes_accessed=bytes_accessed)

    out_full = pl.pallas_call(
        kernel,
        out_shape=jax.ShapeDtypeStruct((Bp, out_pad), jnp.bfloat16),
        grid=(Bp // tm,),
        in_specs=([pl.BlockSpec((tm, in_dim), lambda i: (i, 0))]
                  + w_specs
                  + [_resident_spec(b_all.shape)]),
        out_specs=pl.BlockSpec((tm, out_pad), lambda i: (i, 0)),
        compiler_params=pltpu.CompilerParams(
            dimension_semantics=("parallel",),       # v7x: split tiles across TCs
            vmem_limit_bytes=48 * 1024 * 1024),      # headroom for tm=1024 on v5e
        cost_estimate=cost,
    )(xp, *ws, b_all)

    return out_full[:B, :output_dim].astype(jnp.float32)


# -----------------------------------------------------------------------------
# Plain-JAX reference (same bf16-into-MXU / f32-accumulate arithmetic)
# -----------------------------------------------------------------------------
def fc_generator_reference(x, params):
    h = x
    for i, (w, b) in enumerate(params):
        y = jnp.dot(h.astype(jnp.bfloat16), w.astype(jnp.bfloat16),
                    preferred_element_type=jnp.float32) + b
        h = jnp.maximum(y, 0.0) if i < len(params) - 1 else y
    return jax.nn.sigmoid(h)


if __name__ == "__main__":
    key = jax.random.PRNGKey(0)
    k_params, k_x = jax.random.split(key)

    batch = 64
    input_dim = 32    # latent noise dimension fed to the generator
    output_dim = 16   # data.n_labels analogue

    params = init_fc_generator_params(k_params, input_dim, output_dim)
    x = jax.random.normal(k_x, (batch, input_dim), dtype=jnp.float32)

    # Default tile_m=1024 collapses to a 2-step grid of 32 rows here, so the
    # small test still exercises multi-step pipelining + megacore split.
    out = fc_generator_forward(x, params)
    out = jax.block_until_ready(out)

    ref = fc_generator_reference(x, params)
    assert out.shape == (batch, output_dim), out.shape
    assert jnp.allclose(out, ref, atol=1e-2, rtol=1e-2), (
        "mismatch vs reference, max abs err = %g"
        % float(jnp.max(jnp.abs(out - ref))))

    print("KERNEL_OK")
</pallas_src>

<mosaic_0001>
module attributes {stable_mosaic.version = 11 : i64} {
  func.func @kernel(%arg0: i32, %arg1: memref<32x32xf32, #tpu.memory_space<vmem>>, %arg2: memref<32x256xbf16, #tpu.memory_space<vmem>>, %arg3: memref<256x512xbf16, #tpu.memory_space<vmem>>, %arg4: memref<512x256xbf16, #tpu.memory_space<vmem>>, %arg5: memref<256x128xbf16, #tpu.memory_space<vmem>>, %arg6: memref<128x128xbf16, #tpu.memory_space<vmem>>, %arg7: memref<128x128xbf16, #tpu.memory_space<vmem>>, %arg8: memref<1x1408xf32, #tpu.memory_space<vmem>>, %arg9: memref<32x128xbf16, #tpu.memory_space<vmem>>) attributes {dimension_semantics = [#tpu.dimension_semantics<parallel>], iteration_bounds = array<i64: 2>, scalar_prefetch = 0 : i64, scratch_operands = 0 : i64, tpu.core_type = #tpu.core_type<tc>, window_params = [{transform_indices = @transform_0, window_bounds = array<i64: 32, 32>}, {pipeline_mode = #tpu.pipeline_mode<synchronous>, transform_indices = @transform_1, window_bounds = array<i64: 32, 256>}, {pipeline_mode = #tpu.pipeline_mode<synchronous>, transform_indices = @transform_2, window_bounds = array<i64: 256, 512>}, {pipeline_mode = #tpu.pipeline_mode<synchronous>, transform_indices = @transform_3, window_bounds = array<i64: 512, 256>}, {pipeline_mode = #tpu.pipeline_mode<synchronous>, transform_indices = @transform_4, window_bounds = array<i64: 256, 128>}, {pipeline_mode = #tpu.pipeline_mode<synchronous>, transform_indices = @transform_5, window_bounds = array<i64: 128, 128>}, {pipeline_mode = #tpu.pipeline_mode<synchronous>, transform_indices = @transform_6, window_bounds = array<i64: 128, 128>}, {pipeline_mode = #tpu.pipeline_mode<synchronous>, transform_indices = @transform_7, window_bounds = array<i64: 1, 1408>}, {transform_indices = @transform_8, window_bounds = array<i64: 32, 128>}]} {
    %c0 = arith.constant 0 : index
    %c0_0 = arith.constant 0 : index
    %0 = vector.load %arg1[%c0, %c0_0] : memref<32x32xf32, #tpu.memory_space<vmem>>, vector<32x32xf32>
    %1 = arith.truncf %0 : vector<32x32xf32> to vector<32x32xbf16>
    %c0_1 = arith.constant 0 : index
    %c0_2 = arith.constant 0 : index
    %2 = vector.load %arg2[%c0_1, %c0_2] : memref<32x256xbf16, #tpu.memory_space<vmem>>, vector<32x256xbf16>
    %cst = arith.constant dense<0.000000e+00> : vector<32x256xf32>
    %3 = tpu.matmul %1, %2, %cst {dimension_numbers = #tpu.dot_dimension_numbers<[1], [0], [0], [1], [0, 0, 1, 1], [], []>} : vector<32x32xbf16>, vector<32x256xbf16>, vector<32x256xf32> -> vector<32x256xf32>
    %c0_3 = arith.constant 0 : index
    %c0_4 = arith.constant 0 : index
    %4 = vector.load %arg8[%c0_3, %c0_4] : memref<1x1408xf32, #tpu.memory_space<vmem>>, vector<1x256xf32>
    %5 = vector.broadcast %4 : vector<1x256xf32> to vector<32x256xf32>
    %6 = arith.addf %3, %5 : vector<32x256xf32>
    %cst_5 = arith.constant 0.000000e+00 : f32
    %7 = vector.broadcast %cst_5 : f32 to vector<32x256xf32>
    %8 = arith.maximumf %6, %7 : vector<32x256xf32>
    %9 = arith.truncf %8 : vector<32x256xf32> to vector<32x256xbf16>
    %c0_6 = arith.constant 0 : index
    %c0_7 = arith.constant 0 : index
    %10 = vector.load %arg3[%c0_6, %c0_7] : memref<256x512xbf16, #tpu.memory_space<vmem>>, vector<256x512xbf16>
    %cst_8 = arith.constant dense<0.000000e+00> : vector<32x512xf32>
    %11 = tpu.matmul %9, %10, %cst_8 {dimension_numbers = #tpu.dot_dimension_numbers<[1], [0], [0], [1], [0, 0, 1, 1], [], []>} : vector<32x256xbf16>, vector<256x512xbf16>, vector<32x512xf32> -> vector<32x512xf32>
    %c0_9 = arith.constant 0 : index
    %c256 = arith.constant 256 : index
    %12 = vector.load %arg8[%c0_9, %c256] : memref<1x1408xf32, #tpu.memory_space<vmem>>, vector<1x512xf32>
    %13 = vector.broadcast %12 : vector<1x512xf32> to vector<32x512xf32>
    %14 = arith.addf %11, %13 : vector<32x512xf32>
    %cst_10 = arith.constant 0.000000e+00 : f32
    %15 = vector.broadcast %cst_10 : f32 to vector<32x512xf32>
    %16 = arith.maximumf %14, %15 : vector<32x512xf32>
    %17 = arith.truncf %16 : vector<32x512xf32> to vector<32x512xbf16>
    %c0_11 = arith.constant 0 : index
    %c0_12 = arith.constant 0 : index
    %18 = vector.load %arg4[%c0_11, %c0_12] : memref<512x256xbf16, #tpu.memory_space<vmem>>, vector<512x256xbf16>
    %cst_13 = arith.constant dense<0.000000e+00> : vector<32x256xf32>
    %19 = tpu.matmul %17, %18, %cst_13 {dimension_numbers = #tpu.dot_dimension_numbers<[1], [0], [0], [1], [0, 0, 1, 1], [], []>} : vector<32x512xbf16>, vector<512x256xbf16>, vector<32x256xf32> -> vector<32x256xf32>
    %c0_14 = arith.constant 0 : index
    %c768 = arith.constant 768 : index
    %20 = vector.load %arg8[%c0_14, %c768] : memref<1x1408xf32, #tpu.memory_space<vmem>>, vector<1x256xf32>
    %21 = vector.broadcast %20 : vector<1x256xf32> to vector<32x256xf32>
    %22 = arith.addf %19, %21 : vector<32x256xf32>
    %cst_15 = arith.constant 0.000000e+00 : f32
    %23 = vector.broadcast %cst_15 : f32 to vector<32x256xf32>
    %24 = arith.maximumf %22, %23 : vector<32x256xf32>
    %25 = arith.truncf %24 : vector<32x256xf32> to vector<32x256xbf16>
    %c0_16 = arith.constant 0 : index
    %c0_17 = arith.constant 0 : index
    %26 = vector.load %arg5[%c0_16, %c0_17] : memref<256x128xbf16, #tpu.memory_space<vmem>>, vector<256x128xbf16>
    %cst_18 = arith.constant dense<0.000000e+00> : vector<32x128xf32>
    %27 = tpu.matmul %25, %26, %cst_18 {dimension_numbers = #tpu.dot_dimension_numbers<[1], [0], [0], [1], [0, 0, 1, 1], [], []>} : vector<32x256xbf16>, vector<256x128xbf16>, vector<32x128xf32> -> vector<32x128xf32>
    %c0_19 = arith.constant 0 : index
    %c1024 = arith.constant 1024 : index
    %28 = vector.load %arg8[%c0_19, %c1024] : memref<1x1408xf32, #tpu.memory_space<vmem>>, vector<1x128xf32>
    %29 = vector.broadcast %28 : vector<1x128xf32> to vector<32x128xf32>
    %30 = arith.addf %27, %29 : vector<32x128xf32>
    %cst_20 = arith.constant 0.000000e+00 : f32
    %31 = vector.broadcast %cst_20 : f32 to vector<32x128xf32>
    %32 = arith.maximumf %30, %31 : vector<32x128xf32>
    %33 = arith.truncf %32 : vector<32x128xf32> to vector<32x128xbf16>
    %c0_21 = arith.constant 0 : index
    %c0_22 = arith.constant 0 : index
    %34 = vector.load %arg6[%c0_21, %c0_22] : memref<128x128xbf16, #tpu.memory_space<vmem>>, vector<128x128xbf16>
    %cst_23 = arith.constant dense<0.000000e+00> : vector<32x128xf32>
    %35 = tpu.matmul %33, %34, %cst_23 {dimension_numbers = #tpu.dot_dimension_numbers<[1], [0], [0], [1], [0, 0, 1, 1], [], []>} : vector<32x128xbf16>, vector<128x128xbf16>, vector<32x128xf32> -> vector<32x128xf32>
    %c0_24 = arith.constant 0 : index
    %c1152 = arith.constant 1152 : index
    %36 = vector.load %arg8[%c0_24, %c1152] : memref<1x1408xf32, #tpu.memory_space<vmem>>, vector<1x128xf32>
    %37 = vector.broadcast %36 : vector<1x128xf32> to vector<32x128xf32>
    %38 = arith.addf %35, %37 : vector<32x128xf32>
    %cst_25 = arith.constant 0.000000e+00 : f32
    %39 = vector.broadcast %cst_25 : f32 to vector<32x128xf32>
    %40 = arith.maximumf %38, %39 : vector<32x128xf32>
    %41 = arith.truncf %40 : vector<32x128xf32> to vector<32x128xbf16>
    %c0_26 = arith.constant 0 : index
    %c0_27 = arith.constant 0 : index
    %42 = vector.load %arg7[%c0_26, %c0_27] : memref<128x128xbf16, #tpu.memory_space<vmem>>, vector<128x128xbf16>
    %cst_28 = arith.constant dense<0.000000e+00> : vector<32x128xf32>
    %43 = tpu.matmul %41, %42, %cst_28 {dimension_numbers = #tpu.dot_dimension_numbers<[1], [0], [0], [1], [0, 0, 1, 1], [], []>} : vector<32x128xbf16>, vector<128x128xbf16>, vector<32x128xf32> -> vector<32x128xf32>
    %c0_29 = arith.constant 0 : index
    %c1280 = arith.constant 1280 : index
    %44 = vector.load %arg8[%c0_29, %c1280] : memref<1x1408xf32, #tpu.memory_space<vmem>>, vector<1x128xf32>
    %45 = vector.broadcast %44 : vector<1x128xf32> to vector<32x128xf32>
    %46 = arith.addf %43, %45 : vector<32x128xf32>
    %47 = arith.negf %46 : vector<32x128xf32>
    %48 = math.exp %47 : vector<32x128xf32>
    %cst_30 = arith.constant 1.000000e+00 : f32
    %49 = vector.broadcast %cst_30 : f32 to vector<32x128xf32>
    %50 = arith.addf %49, %48 : vector<32x128xf32>
    %51 = arith.divf %49, %50 : vector<32x128xf32>
    %52 = arith.truncf %51 : vector<32x128xf32> to vector<32x128xbf16>
    %c0_31 = arith.constant 0 : index
    %c0_32 = arith.constant 0 : index
    %53 = vector.load %arg9[%c0_31, %c0_32] : memref<32x128xbf16, #tpu.memory_space<vmem>>, vector<32x128xbf16>
    tpu.vector_store %arg9[%c0_31, %c0_32], %52 {strides = array<i32>} : memref<32x128xbf16, #tpu.memory_space<vmem>>, vector<32x128xbf16>,
    return
  }
  func.func @transform_0(%arg0: i32) -> (i32, i32) {
    %c0_i32 = arith.constant 0 : i32
    %c0_i32_0 = arith.constant 0 : i32
    return %arg0, %c0_i32 : i32, i32
  }
  func.func @transform_1(%arg0: i32) -> (i32, i32) {
    %c0_i32 = arith.constant 0 : i32
    %c0_i32_0 = arith.constant 0 : i32
    %c0_i32_1 = arith.constant 0 : i32
    return %c0_i32, %c0_i32_0 : i32, i32
  }
  func.func @transform_2(%arg0: i32) -> (i32, i32) {
    %c0_i32 = arith.constant 0 : i32
    %c0_i32_0 = arith.constant 0 : i32
    %c0_i32_1 = arith.constant 0 : i32
    return %c0_i32, %c0_i32_0 : i32, i32
  }
  func.func @transform_3(%arg0: i32) -> (i32, i32) {
    %c0_i32 = arith.constant 0 : i32
    %c0_i32_0 = arith.constant 0 : i32
    %c0_i32_1 = arith.constant 0 : i32
    return %c0_i32, %c0_i32_0 : i32, i32
  }
  func.func @transform_4(%arg0: i32) -> (i32, i32) {
    %c0_i32 = arith.constant 0 : i32
    %c0_i32_0 = arith.constant 0 : i32
    %c0_i32_1 = arith.constant 0 : i32
    return %c0_i32, %c0_i32_0 : i32, i32
  }
  func.func @transform_5(%arg0: i32) -> (i32, i32) {
    %c0_i32 = arith.constant 0 : i32
    %c0_i32_0 = arith.constant 0 : i32
    %c0_i32_1 = arith.constant 0 : i32
    return %c0_i32, %c0_i32_0 : i32, i32
  }
  func.func @transform_6(%arg0: i32) -> (i32, i32) {
    %c0_i32 = arith.constant 0 : i32
    %c0_i32_0 = arith.constant 0 : i32
    %c0_i32_1 = arith.constant 0 : i32
    return %c0_i32, %c0_i32_0 : i32, i32
  }
  func.func @transform_7(%arg0: i32) -> (i32, i32) {
    %c0_i32 = arith.constant 0 : i32
    %c0_i32_0 = arith.constant 0 : i32
    %c0_i32_1 = arith.constant 0 : i32
    return %c0_i32, %c0_i32_0 : i32, i32
  }
  func.func @transform_8(%arg0: i32) -> (i32, i32) {
    %c0_i32 = arith.constant 0 : i32
    %c0_i32_0 = arith.constant 0 : i32
    return %arg0, %c0_i32 : i32, i32
  }
}

</mosaic_0001>

<bundles_post_ra>
// kernel: tpu_custom_call.1
= control target key start
LH: loop header
LB: loop body
LE: loop exit
PB: predicated region body
PF: predicated region fallthrough
CT: control target
= control target key end

     0   :  { %13 = vsyncpa [#allocation3], 0  ;;  %s3235_s0 = inlined_call_operand.vmem [shape: f32[64,32], index: 0, kind: input, shape index: {}]   ;;  %s3236_s1 = inlined_call_operand.vmem [shape: bf16[32,256], index: 1, kind: input, shape index: {}]   ;;  %s3237_s2 = inlined_call_operand.hbm [shape: bf16[256,512], index: 2, kind: input, shape index: {}]   ;;  %s3238_s3 = inlined_call_operand.hbm [shape: bf16[512,256], index: 3, kind: input, shape index: {}]   ;;  %s3239_s4 = inlined_call_operand.hbm [shape: bf16[256,128], index: 4, kind: input, shape index: {}]   ;;  %s3240_s5 = inlined_call_operand.vmem [shape: bf16[128,128], index: 5, kind: input, shape index: {}]   ;;  %s3241_s6 = inlined_call_operand.hbm [shape: bf16[128,128], index: 6, kind: input, shape index: {}]   ;;  %s3242_s7 = inlined_call_operand.vmem [shape: f32[1,1408], index: 7, kind: input, shape index: {}]   ;;  %s3243_s8 = inlined_call_operand.hbm [shape: bf16[64,128], index: 8, kind: output, shape index: {}]  }
   0x1   :  { %14 = vsyncpa [#allocation6], 0 }
   0x2   :  { %15 = vsyncpa [#allocation9], 0 }
   0x3   :  { %16 = vsyncpa [#allocation4], 0 }
   0x4   :  { %18 = vsyncpa [#allocation4 + $0x1], 0  ;;  %s3001_s27 = smov 0   ;;  %s3003_s28 = smov 0  }
   0x5   :  { %s3005_s29 = smov 0   ;;  %s3007_s30 = smov 0  }
   0x6 LB: > { %s3022_s9 = sadd.s32 4294967295, %s2940_s30   ;;  %s2128_s10 = sadd.s32 4294967294, %s2940_s30   ;;  %s2940_s30 = sphi %s3007_s30, %s3259_s30   ;;  %s2936_s29 = sphi %s3005_s29, %s3258_s29   ;;  %s2932_s28 = sphi %s3003_s28, %s3257_s28   ;;  %s2928_s27 = sphi %s3001_s27, %s3256_s27  }
   0x7   : > { %s3026_s11 = sadd.s32 1, %s2940_s30   ;;  %s204_s12 = sadd.s32 1, %s2936_s29 }
   0x8   : > { %s201_s13 = ssub.s32 %s2940_s30, %s3026_s11  ;;  %p214_p0 = scmp.ne.s32.totalorder %s2936_s29, %s2932_s28 }
   0x9   : > { %p202_p1 = scmp.eq.s32.totalorder %s201_s13, 0  ;;  %p215_p2 = scmp.eq.s32.totalorder %s3022_s9, 1 }
   0xa   : > { %p220_p3 = scmp.ne.s32.totalorder %s2932_s28, %s2928_s27  ;;  %p221_p4 = scmp.eq.s32.totalorder %s2128_s10, 1 }
   0xb   : > { %s3037_s14 = scalar_select %p202_p1, %s2936_s29, %s204_s12  }
   0xc   : > { %p3039_p5 = por %p215_p2, %p214_p0  ;;  %p3043_p6 = por %p221_p4, %p220_p3 }
   0xd   : > { %p2129_p7 = scmp.ge.s32.totalorder %s2940_s30, 1  ;;  %p228_p8 = scmp.lt.s32.totalorder %s2940_s30, 3 }
   0xe   : > { %s3246_s16 = scalar_select %p3043_p6, 1, 0 }
   0xf   : > { %p3244_p9 = scmp.eq.s32.totalorder %s3022_s9, 0  ;;  %p3050_p10 = pnand %p2129_p7, %p228_p8 }
  0x10   : > { %s2942_s18 = smov [#allocation5]   ;;  %s2943_s21 = smov [#allocation2]  }
  0x11   : > { %s256_s19 = sshll.u32 %s2942_s18, 4  ;;  %p2447_p11 = pneg %p3050_p10  ;;  %s257_s19 = int_to_ptr.vmem [resolvable:$true] %s256_s19 }
  0x12   : > { %s243_s22 = sshll.u32 %s2943_s21, 4  ;;  %s2775_s23 = scalar_lea.vmem %s257_s19, 8192  ;;  %s244_s22 = int_to_ptr.vmem [resolvable:$true] %s243_s22 }
  0x13   : > { %p3058_p12 = pnand %p3244_p9, %p2447_p11  ;;  %p2776_p0 = scmp.ne.s32.totalorder %s257_s19, %s2775_s23 }
  0x14   : > { %p2783_p3 = scmp.lt.s32.totalorder %s257_s19, %s257_s19  ;;  %p2784_p4 = scmp.lt.s32.totalorder %s2775_s23, %s2775_s23 }
  0x15   : > { %p2766_p13 = pneg %p3058_p12 }
  0x16   : > { %p2785_p7 = por %p2784_p4, %p2783_p3 }
  0x17   : > { %p2778_p1 = pnand %p2776_p0, %p2766_p13 }
  0x19   : > { %p2779_p2 = pneg %p2778_p1 }
  0x1b   : > { %p2786_p8 = pnand %p2785_p7, %p2779_p2 }
  0x1d   : > { %2789 = shalt.err (!%p2786_p8)
}
  0x1e   : > { %s2944_s24 = smov 128   ;;  %s2945_s25 = smov 8  }
  0x1f   : > { %2453 = dma.hbm_to_vmem [thread:$0]  (!%p3058_p12), %s3238_s3, 8192, %s257_s19, [#allocation6], %s2944_s24, %s2944_s24, %s2945_s25  }
  0x20   : > { %s2801_s12 = scalar_lea.vmem %s244_s22, 8192  ;;  %p2809_p9 = scmp.lt.s32.totalorder %s244_s22, %s244_s22 }
  0x21   : > { %p2802_p11 = scmp.ne.s32.totalorder %s244_s22, %s2801_s12  ;;  %p2810_p6 = scmp.lt.s32.totalorder %s2801_s12, %s2801_s12 }
  0x23   : > { %p2804_p0 = pnand %p2802_p11, %p2766_p13  ;;  %p2811_p3 = por %p2810_p6, %p2809_p9 }
  0x25   : > { %p2805_p1 = pneg %p2804_p0 }
  0x27   : > { %p2812_p2 = pnand %p2811_p3, %p2805_p1 }
  0x29   : > { %2815 = shalt.err (!%p2812_p2)
}
  0x2a   : > { %s2946_s13 = smov 256   ;;  %s2947_s18 = smov 16  }
  0x2b   : > { %2450 = dma.hbm_to_vmem [thread:$0]  (!%p3058_p12), %s3237_s2, 8192, %s244_s22, [#allocation3], %s2946_s13, %s2946_s13, %s2947_s18  }
  0x2c   : > { %s2948_s19 = smov [#allocation7]  }
  0x2d   : > { %s269_s24 = sshll.u32 %s2948_s19, 4  ;;  %s270_s24 = int_to_ptr.vmem [resolvable:$true] %s269_s24 }
  0x2e   : > { %s2827_s25 = scalar_lea.vmem %s270_s24, 2048  ;;  %p2835_p9 = scmp.lt.s32.totalorder %s270_s24, %s270_s24 }
  0x2f   : > { %p2828_p4 = scmp.ne.s32.totalorder %s270_s24, %s2827_s25  ;;  %p2836_p8 = scmp.lt.s32.totalorder %s2827_s25, %s2827_s25 }
  0x31   : > { %p2830_p7 = pnand %p2828_p4, %p2766_p13  ;;  %p2837_p11 = por %p2836_p8, %p2835_p9 }
  0x33   : > { %p2831_p6 = pneg %p2830_p7 }
  0x35   : > { %p2838_p0 = pnand %p2837_p11, %p2831_p6 }
  0x37   : > { %2841 = shalt.err (!%p2838_p0)
}
  0x38   : > { %s2949_s26 = smov 64   ;;  %s2950_s10 = smov 4  }
  0x39   : > { %2456 = dma.hbm_to_vmem [thread:$0]  (!%p3058_p12), %s3239_s4, 2048, %s270_s24, [#allocation6], %s2949_s26, %s2949_s26, %s2950_s10  }
  0x3a   : > { %s2951_s13 = smov [#allocation8]  }
  0x3b   : > { %s285_s18 = sshll.u32 %s2951_s13, 4  ;;  %s286_s18 = int_to_ptr.vmem [resolvable:$true] %s285_s18 }
  0x3c   : > { %s2853_s21 = scalar_lea.vmem %s286_s18, 1024  ;;  %p2861_p4 = scmp.lt.s32.totalorder %s286_s18, %s286_s18 }
  0x3d   : > { %p2854_p1 = scmp.ne.s32.totalorder %s286_s18, %s2853_s21  ;;  %p2862_p7 = scmp.lt.s32.totalorder %s2853_s21, %s2853_s21 }
  0x3f   : > { %p2856_p3 = pnand %p2854_p1, %p2766_p13  ;;  %p2863_p6 = por %p2862_p7, %p2861_p4 }
  0x41   : > { %p2857_p2 = pneg %p2856_p3 }
  0x43   : > { %p2864_p9 = pnand %p2863_p6, %p2857_p2 }
  0x45   : > { %2867 = shalt.err (!%p2864_p9)
}
  0x46   : > { %2459 = dma.hbm_to_vmem [thread:$0]  (!%p3058_p12), %s3241_s6, 1024, %s286_s18, [#allocation9], %s2949_s26, %s2949_s26, %s2950_s10  }
  0x47   : > { %313 = sbr.rel (%p3050_p10) target bundleno = 1383 (0x567), region = 52  ;;  %p3249_p8 = scmp.eq.s32.totalorder (!%p3050_p10), %s3022_s9, 0 }
  0x4c   : > { %2911 = dma.done.wait (%p3249_p8), [#allocation3], 8192   ;;  %p3250_p13 = pmov %p3249_p8 }
  0x4d   : > { %p3251_p11 = pmov %p3249_p8 }
  0x4e   : > { %2913 = vsyncadd (%p3250_p13), [#allocation3], 4294959104 }
  0x4f   : > { %2915 = dma.done.wait (%p3251_p11), [#allocation6], 10240   ;;  %p3252_p0 = pmov %p3249_p8 }
  0x51   : > { %2917 = vsyncadd (%p3252_p0), [#allocation6], 4294957056  ;;  %p3253_p1 = pmov %p3252_p0 }
  0x52   : > { %p3254_p12 = pmov %p3252_p0 }
  0x53   : > { %2919 = dma.done.wait (%p3253_p1), [#allocation9], 1024  }
  0x54   : > { %2921 = vsyncadd (%p3254_p12), [#allocation9], 4294966272  ;;  %s2141_s17 = sshll.u32 %s3022_s9, 2  ;;  %v2952_v0 = vmov 0   ;;  %v2518_v1 = vld [vmem:[%s3236_s1 + $0x14] ss:$8 sps:$4 sm:$0xff]  }
  0x55   : > { %448 = vmatprep.mubr.bf16.mxu0 %v2952_v0  ;;  %p360_p10 = scmp.lt.s32.totalorder %s2141_s17, 7  ;;  %v2520_v2 = vld [vmem:[%s3236_s1 + $0x10] ss:$8 sps:$4 sm:$0xff]   ;;  %428 = vmatprep.subr.bf16.mxu0 %v2518_v1  ;;  %v2521_v3 = vld [vmem:[%s3236_s1 + $0x4] ss:$8 sps:$4 sm:$0xff]   ;;  %vm409_vm0 = vcmask 261120  }
  0x56   : > { %429 = vmatpush1.bf16.msra.mxu0 %v2520_v2  ;;  %v2523_v4 = vld [vmem:[%s3236_s1] ss:$8 sps:$4 sm:$0xff]   ;;  %v2524_v7 = vld [vmem:[#allocation2 + $0xe4] ss:$16 sps:$4 sm:$0xff]   ;;  %v2528_v10 = vld [vmem:[#allocation2 + $0xec] ss:$16 sps:$4 sm:$0xff]  }
  0x57   : > { %s3261_s17 = smov (!%p360_p10, %s2141_s17), 7  ;;  %430 = vmatprep.subr.bf16.mxu0 %v2521_v3  ;;  %v2526_v8 = vld [vmem:[#allocation2 + $0xe8] ss:$16 sps:$4 sm:$0xff]   ;;  %887 = vmatprep.subr.bf16.mxu1 %v2524_v7  ;;  %v2529_v11 = vld [vmem:[#allocation2 + $0xe0] ss:$16 sps:$4 sm:$0xff]   ;;  %s356_s24 = sand.u32 1, %s2932_s28  }
  0x58   : > { %s2142_s20 = sshll.u32 %s3261_s17, 3  ;;  %v2530_v12 = vld [vmem:[#allocation2 + $0xc4] ss:$16 sps:$4 sm:$0xff]   ;;  %888 = vmatpush1.bf16.msra.mxu1 %v2529_v11  ;;  %v2534_v13 = vld [vmem:[#allocation2 + $0xcc] ss:$16 sps:$4 sm:$0xff]   ;;  %s2140_s25 = sshll.u32 %s356_s24, 4 }
  0x59   : > { %s363_s22 = scalar_lea.vmem %s3235_s0, %s2142_s20  ;;  %889 = vmatprep.subr.bf16.mxu1 %v2530_v12  ;;  %v2535_v15 = vld [vmem:[#allocation2 + $0xc0] ss:$16 sps:$4 sm:$0xff]   ;;  %v2536_v16 = vld [vmem:[#allocation2 + $0xa4] ss:$16 sps:$4 sm:$0xff]   ;;  %v2532_v18 = vld [vmem:[#allocation2 + $0xc8] ss:$16 sps:$4 sm:$0xff]  }
  0x5a   : > { %v367_v5 = vld [vmem:[%s363_s22] sm:$0xff]  ;;  %v368_v6 = vld [vmem:[%s363_s22 + $0x8] sm:$0xff]  ;;  %431 = vmatpush1.bf16.msra.mxu0 %v2523_v4  ;;  %v369_v14 = vld [vmem:[%s363_s22 + $0x10] sm:$0xff]  ;;  %s2329_s26 = sshll.u32 %s3022_s9, 8  ;;  %s358_s10 = scalar_lea.vmem [#allocation10], %s2140_s25 }
  0x5b   : > { %v371_v9 = vpack.c.bf16 %v368_v6, %v367_v5  ;;  %940 = vmatprep.subr.bf16.mxu0 %v2528_v10  ;;  %v370_v17 = vld [vmem:[%s363_s22 + $0x18] sm:$0xff]  ;;  %v2541_v20 = vld [vmem:[#allocation2 + $0xa0] ss:$16 sps:$4 sm:$0xff]   ;;  %v2542_v21 = vld [vmem:[#allocation2 + $0x84] ss:$16 sps:$4 sm:$0xff]   ;;  %s2025_s22 = sshll.u32 %s358_s10, 4  ;;  %s3191_s18 = scalar_lea.hbm %s3243_s8, %s2329_s26  ;;  %s3193_s22 = int_to_ptr.vmem [resolvable:$true] %s2025_s22 }
  0x5c   : > { %v2540_v19 = vld [vmem:[#allocation2 + $0xac] ss:$16 sps:$4 sm:$0xff]   ;;  %890 = vmatpush1.bf16.msra.mxu1 %v2535_v15  ;;  %v372_v22 = vpack.c.bf16 %v370_v17, %v369_v14  ;;  %v2538_v23 = vld [vmem:[#allocation2 + $0xa8] ss:$16 sps:$4 sm:$0xff]   ;;  %v2547_v25 = vld [vmem:[#allocation2 + $0x80] ss:$16 sps:$4 sm:$0xff]  }
  0x5d   : > { %2147 = vmatmul.mubr.msk.bf16.vlgmr.msra.gmra.mxu0 %vm409_vm0, %v371_v9  ;;  %891 = vmatprep.subr.bf16.mxu1 %v2536_v16  ;;  %v2546_v24 = vld [vmem:[#allocation2 + $0x8c] ss:$16 sps:$4 sm:$0xff]   ;;  %v2548_v26 = vld [vmem:[#allocation2 + $0x64] ss:$16 sps:$4 sm:$0xff]   ;;  %v2544_v27 = vld [vmem:[#allocation2 + $0x88] ss:$16 sps:$4 sm:$0xff]  }
  0x5e   : > { %458 = vmatprep.mubr.bf16.mxu0 %v2952_v0  ;;  %941 = vmatpush1.bf16.msra.mxu0 %v2526_v8  ;;  %v2552_v28 = vld [vmem:[#allocation2 + $0x6c] ss:$16 sps:$4 sm:$0xff]   ;;  %v2553_v29 = vld [vmem:[#allocation2 + $0x60] ss:$16 sps:$4 sm:$0xff]   ;;  %v2554_v30 = vld [vmem:[#allocation2 + $0x44] ss:$16 sps:$4 sm:$0xff]  }
  0x5f   : > { %942 = vmatprep.subr.bf16.mxu0 %v2534_v13  ;;  %v2550_v31 = vld [vmem:[#allocation2 + $0x68] ss:$16 sps:$4 sm:$0xff]   ;;  %v2558_v32 = vld [vmem:[#allocation2 + $0x4c] ss:$16 sps:$4 sm:$0xff]   ;;  %v2559_v33 = vld [vmem:[#allocation2 + $0x40] ss:$16 sps:$4 sm:$0xff]   ;;  %v379_v13 = vlaneseq }
  0x60   : > { %892 = vmatpush1.bf16.msra.mxu1 %v2541_v20  ;;  %v2560_v34 = vld [vmem:[#allocation2 + $0x24] ss:$16 sps:$4 sm:$0xff]   ;;  %v2556_v35 = vld [vmem:[#allocation2 + $0x48] ss:$16 sps:$4 sm:$0xff]   ;;  %v2564_v36 = vld [vmem:[#allocation2 + $0x2c] ss:$16 sps:$4 sm:$0xff]  }
  0x61   : > { %893 = vmatprep.subr.bf16.mxu1 %v2542_v21  ;;  %v2565_v37 = vld [vmem:[#allocation2 + $0x20] ss:$16 sps:$4 sm:$0xff]   ;;  %v2566_v38 = vld [vmem:[#allocation2 + $0x4] ss:$16 sps:$4 sm:$0xff]   ;;  %v2562_v39 = vld [vmem:[#allocation2 + $0x28] ss:$16 sps:$4 sm:$0xff]  }
  0x62   : > { %943 = vmatpush1.bf16.msra.mxu0 %v2532_v18  ;;  %v2570_v40 = vld [vmem:[#allocation2 + $0xc] ss:$16 sps:$4 sm:$0xff]   ;;  %v2571_v41 = vld [vmem:[#allocation2] ss:$16 sps:$4 sm:$0xff]   ;;  %v2572_v42 = vld [vmem:[#allocation2 + $0x1e4] ss:$16 sps:$4 sm:$0xff]  }
  0x63   : > { %944 = vmatprep.subr.bf16.mxu0 %v2540_v19  ;;  %v2568_v43 = vld [vmem:[#allocation2 + $0x8] ss:$16 sps:$4 sm:$0xff]   ;;  %v2576_v44 = vld [vmem:[#allocation2 + $0x1ec] ss:$16 sps:$4 sm:$0xff]   ;;  %v2577_v45 = vld [vmem:[#allocation2 + $0x1e0] ss:$16 sps:$4 sm:$0xff]  }
  0x64   : > { %894 = vmatpush1.bf16.msra.mxu1 %v2547_v25  ;;  %v2578_v46 = vld [vmem:[#allocation2 + $0x1c4] ss:$16 sps:$4 sm:$0xff]   ;;  %v2574_v47 = vld [vmem:[#allocation2 + $0x1e8] ss:$16 sps:$4 sm:$0xff]   ;;  %v2582_v48 = vld [vmem:[#allocation2 + $0x1cc] ss:$16 sps:$4 sm:$0xff]  }
  0x65   : > { %2148 = vmatmul.mubr.msk.bf16.gmra.mxu0 %vm409_vm0, %v372_v22  ;;  %895 = vmatprep.subr.bf16.mxu1 %v2548_v26  ;;  %v2583_v49 = vld [vmem:[#allocation2 + $0x1c0] ss:$16 sps:$4 sm:$0xff]   ;;  %v2584_v50 = vld [vmem:[#allocation2 + $0x1a4] ss:$16 sps:$4 sm:$0xff]   ;;  %v2580_v51 = vld [vmem:[#allocation2 + $0x1c8] ss:$16 sps:$4 sm:$0xff]  }
  0x66   : > { %945 = vmatpush1.bf16.msra.mxu0 %v2538_v23  ;;  %v2588_v52 = vld [vmem:[#allocation2 + $0x1ac] ss:$16 sps:$4 sm:$0xff]   ;;  %v2589_v53 = vld [vmem:[#allocation2 + $0x1a0] ss:$16 sps:$4 sm:$0xff]   ;;  %v2590_v54 = vld [vmem:[#allocation2 + $0x184] ss:$16 sps:$4 sm:$0xff]  }
  0x67   : > { %946 = vmatprep.subr.bf16.mxu0 %v2546_v24  ;;  %v2586_v55 = vld [vmem:[#allocation2 + $0x1a8] ss:$16 sps:$4 sm:$0xff]   ;;  %v2594_v56 = vld [vmem:[#allocation2 + $0x18c] ss:$16 sps:$4 sm:$0xff]   ;;  %v2595_v57 = vld [vmem:[#allocation2 + $0x180] ss:$16 sps:$4 sm:$0xff]  }
  0x68   : > { %896 = vmatpush1.bf16.msra.mxu1 %v2553_v29  ;;  %v2596_v58 = vld [vmem:[#allocation2 + $0x164] ss:$16 sps:$4 sm:$0xff]   ;;  %v2592_v59 = vld [vmem:[#allocation2 + $0x188] ss:$16 sps:$4 sm:$0xff]   ;;  %v2600_v60 = vld [vmem:[#allocation2 + $0x16c] ss:$16 sps:$4 sm:$0xff]  }
  0x69   : > { %897 = vmatprep.subr.bf16.mxu1 %v2554_v30  ;;  %v2601_v61 = vld [vmem:[#allocation2 + $0x160] ss:$16 sps:$4 sm:$0xff]   ;;  %v2598_v62 = vld [vmem:[#allocation2 + $0x168] ss:$16 sps:$4 sm:$0xff]   ;;  %v2602_v63 = vld [vmem:[#allocation2 + $0x144] ss:$16 sps:$4 sm:$0xff]  }
  0x6a   : > { %947 = vmatpush1.bf16.msra.mxu0 %v2544_v27  ;;  %v2606_v0 = vld [vmem:[#allocation2 + $0x14c] ss:$16 sps:$4 sm:$0xff]   ;;  %v2604_v1 = vld [vmem:[#allocation2 + $0x148] ss:$16 sps:$4 sm:$0xff]   ;;  %v2607_v2 = vld [vmem:[#allocation2 + $0x140] ss:$16 sps:$4 sm:$0xff]  }
  0x6b   : > { %948 = vmatprep.subr.bf16.mxu0 %v2552_v28  ;;  %v2608_v3 = vld [vmem:[#allocation2 + $0x124] ss:$16 sps:$4 sm:$0xff]   ;;  %v2612_v4 = vld [vmem:[#allocation2 + $0x12c] ss:$16 sps:$4 sm:$0xff]   ;;  %v2610_v5 = vld [vmem:[#allocation2 + $0x128] ss:$16 sps:$4 sm:$0xff]  }
  0x6c   : > { %898 = vmatpush1.bf16.msra.mxu1 %v2559_v33  ;;  %v2613_v6 = vld [vmem:[#allocation2 + $0x120] ss:$16 sps:$4 sm:$0xff]   ;;  %v2614_v7 = vld [vmem:[#allocation2 + $0x104] ss:$16 sps:$4 sm:$0xff]   ;;  %v2618_v8 = vld [vmem:[#allocation2 + $0x10c] ss:$16 sps:$4 sm:$0xff]  }
  0x6d   : > { %899 = vmatprep.subr.bf16.mxu1 %v2560_v34  ;;  %v2616_v9 = vld [vmem:[#allocation2 + $0x108] ss:$16 sps:$4 sm:$0xff]   ;;  %v2619_v10 = vld [vmem:[#allocation2 + $0x100] ss:$16 sps:$4 sm:$0xff]   ;;  %v2622_v11 = vld [vmem:[#allocation5 + $0x74] ss:$8 sps:$4 sm:$0xff]  }
  0x6e   : > { %949 = vmatpush1.bf16.msra.mxu0 %v2550_v31  ;;  %v2625_v12 = vld [vmem:[#allocation5 + $0x174] ss:$8 sps:$4 sm:$0xff]   ;;  %v3128_v14 = vshrl.u32 %v379_v13, 7  ;;  %v377_v17 = vld [vmem:[%s3242_s7] sm:$0x3]  ;;  %s3195_s9 = scalar_lea.sflag [#allocation4], %s356_s24 }
  0x6f   : > { %950 = vmatprep.subr.bf16.mxu0 %v2558_v32  ;;  %v2665_v13 = vld [vmem:[#allocation5 + $0x100] ss:$8 sps:$4 sm:$0xff]   ;;  %s2868_s21 = scalar_lea.vmem %s3193_s22, 256  ;;  %s2953_s23 = smov [#allocation10]  }
  0x70   : > { %900 = vmatpush1.bf16.msra.mxu1 %v2565_v37  ;;  %v3131_v15 = vsub.s32 1, %v3128_v14  ;;  %v3134_v16 = vsub.s32 0, %v3128_v14  ;;  %p2869_p3 = scmp.ne.s32.totalorder %s3193_s22, %s2868_s21  ;;  %s2872_s19 = sshll.u32 %s2953_s23, 4  ;;  %s2873_s19 = int_to_ptr.vmem [resolvable:$false] %s2872_s19 }
  0x71   : > { %901 = vmatprep.subr.bf16.mxu1 %v2566_v38  ;;  %s2874_s17 = scalar_lea.vmem %s2873_s19, 512  ;;  %p2875_p7 = scmp.lt.s32.totalorder %s3193_s22, %s2873_s19 }
  0x72   : > { %951 = vmatpush1.bf16.msra.mxu0 %v2556_v35  ;;  %v386_v19 = vrot.slane %v377_v17, %v3131_v15  ;;  %v382_v20 = vrot.slane %v377_v17, %v3134_v16  ;;  %v2620_v35 = vld [vmem:[#allocation5 + $0x70] ss:$8 sps:$4 sm:$0xff]   ;;  %v2670_v17 = vld [vmem:[#allocation5 + $0xf4] ss:$8 sps:$4 sm:$0xff]   ;;  %p2870_p2 = pnand %p2869_p3, %p3039_p5  ;;  %p2876_p6 = scmp.lt.s32.totalorder %s2874_s17, %s2868_s21 }
  0x73   : > { %952 = vmatprep.subr.bf16.mxu0 %v2564_v36  ;;  %v2623_v36 = vld [vmem:[#allocation5 + $0x170] ss:$8 sps:$4 sm:$0xff]  }
  0x74   : > { %902 = vmatpush1.bf16.msra.mxu1 %v2571_v41  ;;  %p2871_p4 = pneg %p2870_p2  ;;  %p2877_p9 = por %p2876_p6, %p2875_p7 }
  0x75   : > { %903 = vmatprep.subr.bf16.mxu1 %v2572_v42 }
  0x76   : > { %953 = vmatpush1.bf16.msra.mxu0 %v2562_v39  ;;  %v2628_v39 = vld [vmem:[#allocation5 + $0x64] ss:$8 sps:$4 sm:$0xff]   ;;  %p2878_p8 = pnand %p2877_p9, %p2871_p4 }
  0x77   : > { %954 = vmatprep.subr.bf16.mxu0 %v2570_v40  ;;  %v2631_v40 = vld [vmem:[#allocation5 + $0x164] ss:$8 sps:$4 sm:$0xff]  }
  0x78   : > { %904 = vmatpush2.bf16.msra.mxu1 %v2577_v45 }
  0x79   : > { %905 = vmatprep.subr.bf16.mxu1 %v2578_v46  ;;  %v2626_v46 = vld [vmem:[#allocation5 + $0x60] ss:$8 sps:$4 sm:$0xff]  }
  0x7a   : > { %955 = vmatpush1.bf16.msra.mxu0 %v2568_v43 }
  0x7b   : > { %956 = vmatprep.subr.bf16.mxu0 %v2576_v44 }
  0x7c   : > { %906 = vmatpush2.bf16.msra.mxu1 %v2583_v49  ;;  %v2634_v49 = vld [vmem:[#allocation5 + $0x54] ss:$8 sps:$4 sm:$0xff]  }
  0x7d   : > { %907 = vmatprep.subr.bf16.mxu1 %v2584_v50  ;;  %v2637_v50 = vld [vmem:[#allocation5 + $0x154] ss:$8 sps:$4 sm:$0xff]  }
  0x7e   : > { %957 = vmatpush2.bf16.msra.mxu0 %v2574_v47  ;;  %v2629_v47 = vld [vmem:[#allocation5 + $0x160] ss:$8 sps:$4 sm:$0xff]  }
  0x7f   : > { %958 = vmatprep.subr.bf16.mxu0 %v2582_v48 }
  0x80   : > { %908 = vmatpush2.bf16.msra.mxu1 %v2589_v53 }
  0x81   : > { %909 = vmatprep.subr.bf16.mxu1 %v2590_v54 }
  0x82   : > { %959 = vmatpush2.bf16.msra.mxu0 %v2580_v51 }
  0x83   : > { %960 = vmatprep.subr.bf16.mxu0 %v2588_v52 }
  0x84   : > { %910 = vmatpush2.bf16.msra.mxu1 %v2595_v57 }
  0x85   : > { %911 = vmatprep.subr.bf16.mxu1 %v2596_v58  ;;  %v2640_v58 = vld [vmem:[#allocation5 + $0x44] ss:$8 sps:$4 sm:$0xff]  }
  0x86   : > { %961 = vmatpush2.bf16.msra.mxu0 %v2586_v55  ;;  %v2632_v55 = vld [vmem:[#allocation5 + $0x50] ss:$8 sps:$4 sm:$0xff]  }
  0x87   : > { %962 = vmatprep.subr.bf16.mxu0 %v2594_v56  ;;  %v2635_v56 = vld [vmem:[#allocation5 + $0x150] ss:$8 sps:$4 sm:$0xff]  }
  0x88   : > { %912 = vmatpush2.bf16.msra.mxu1 %v2601_v61  ;;  %v2641_v61 = vld [vmem:[#allocation5 + $0x140] ss:$8 sps:$4 sm:$0xff]  }
  0x89   : > { %913 = vmatprep.subr.bf16.mxu1 %v2602_v63  ;;  %v2649_v63 = vld [vmem:[#allocation5 + $0x134] ss:$8 sps:$4 sm:$0xff]  }
  0x8a   : > { %963 = vmatpush2.bf16.msra.mxu0 %v2592_v59  ;;  %v2643_v59 = vld [vmem:[#allocation5 + $0x144] ss:$8 sps:$4 sm:$0xff]  }
  0x8b   : > { %964 = vmatprep.subr.bf16.mxu0 %v2600_v60  ;;  %v2638_v60 = vld [vmem:[#allocation5 + $0x40] ss:$8 sps:$4 sm:$0xff]  }
  0x8c   : > { %914 = vmatpush2.bf16.msra.mxu1 %v2607_v2  ;;  %v2652_v2 = vld [vmem:[#allocation5 + $0x24] ss:$8 sps:$4 sm:$0xff]  }
  0x8d   : > { %915 = vmatprep.subr.bf16.mxu1 %v2608_v3  ;;  %v2655_v3 = vld [vmem:[#allocation5 + $0x124] ss:$8 sps:$4 sm:$0xff]  }
  0x8e   : > { %965 = vmatpush2.bf16.msra.mxu0 %v2598_v62  ;;  %v2646_v62 = vld [vmem:[#allocation5 + $0x34] ss:$8 sps:$4 sm:$0xff]  }
  0x8f   : > { %966 = vmatprep.subr.bf16.mxu0 %v2606_v0  ;;  %v2644_v0 = vld [vmem:[#allocation5 + $0x30] ss:$8 sps:$4 sm:$0xff]  }
  0x90   : > { %916 = vmatpush2.bf16.msra.mxu1 %v2613_v6  ;;  %v2658_v6 = vld [vmem:[#allocation5 + $0x14] ss:$8 sps:$4 sm:$0xff]  }
  0x91   : > { %917 = vmatprep.subr.bf16.mxu1 %v2614_v7  ;;  %v2661_v7 = vld [vmem:[#allocation5 + $0x114] ss:$8 sps:$4 sm:$0xff]  }
  0x92   : > { %967 = vmatpush2.bf16.msra.mxu0 %v2604_v1  ;;  %v2647_v1 = vld [vmem:[#allocation5 + $0x130] ss:$8 sps:$4 sm:$0xff]  }
  0x93   : > { %968 = vmatprep.subr.bf16.mxu0 %v2612_v4  ;;  %v2650_v4 = vld [vmem:[#allocation5 + $0x20] ss:$8 sps:$4 sm:$0xff]  }
  0x94   : > { %918 = vmatpush2.bf16.msra.mxu1 %v2619_v10  ;;  %v2664_v10 = vld [vmem:[#allocation5 + $0x4] ss:$8 sps:$4 sm:$0xff]  }
  0x95   : > { %1413 = vmatprep.subr.bf16.mxu1 %v2622_v11  ;;  %v2667_v11 = vld [vmem:[#allocation5 + $0x104] ss:$8 sps:$4 sm:$0xff]  }
  0x96   : > { %969 = vmatpush2.bf16.msra.mxu0 %v2610_v5  ;;  %v2653_v5 = vld [vmem:[#allocation5 + $0x120] ss:$8 sps:$4 sm:$0xff]  }
  0x97   : > { %970 = vmatprep.subr.bf16.mxu0 %v2618_v8  ;;  %v2656_v8 = vld [vmem:[#allocation5 + $0x10] ss:$8 sps:$4 sm:$0xff]  }
  0x9a   : > { %971 = vmatpush2.bf16.msra.mxu0 %v2616_v9  ;;  %v2659_v9 = vld [vmem:[#allocation5 + $0x110] ss:$8 sps:$4 sm:$0xff]  }
  0x9b   : > { %1466 = vmatprep.subr.bf16.mxu0 %v2625_v12  ;;  %v2662_v12 = vld [vmem:[#allocation5] ss:$8 sps:$4 sm:$0xff]  }
 0x11d   : > { %v450_v18 = vpop.f32.mrf.mxu0 }
 0x11e   : > { %v451_v25 = vadd.f32 %v450_v18, %v382_v20  ;;  %v2673_v18 = vld [vmem:[#allocation5 + $0x1f4] ss:$8 sps:$4 sm:$0xff]  }
 0x11f   : > { %v452_v21 = vpop.f32.mrf.mxu0 }
 0x120   : > { %v453_v23 = vadd.f32 %v452_v21, %v386_v19  ;;  %v469_v32 = vmax.f32 %v451_v25, 0.0  ;;  %v2676_v21 = vld [vmem:[#allocation5 + $0xe4] ss:$8 sps:$4 sm:$0xff]   ;;  %v2682_v25 = vld [vmem:[#allocation5 + $0xd4] ss:$8 sps:$4 sm:$0xff]  }
 0x121   : > { %v454_v22 = vpop.f32.mrf.mxu0 }
 0x122   : > { %v455_v24 = vadd.f32 %v454_v22, %v382_v20  ;;  %v470_v30 = vmax.f32 %v453_v23, 0.0  ;;  %v2679_v22 = vld [vmem:[#allocation5 + $0x1e4] ss:$8 sps:$4 sm:$0xff]   ;;  %v2674_v23 = vld [vmem:[#allocation5 + $0xe0] ss:$8 sps:$4 sm:$0xff]  }
 0x123   : > { %v456_v26 = vpop.f32.mrf.mxu0 }
 0x124   : > { %v457_v27 = vadd.f32 %v456_v26, %v386_v19  ;;  %v471_v28 = vmax.f32 %v455_v24, 0.0  ;;  %v2677_v24 = vld [vmem:[#allocation5 + $0x1e0] ss:$8 sps:$4 sm:$0xff]   ;;  %v2685_v26 = vld [vmem:[#allocation5 + $0x1d4] ss:$8 sps:$4 sm:$0xff]  }
 0x125   : > { %v460_v29 = vpop.f32.mrf.mxu0 }
 0x126   : > { %v472_v31 = vmax.f32 %v457_v27, 0.0  ;;  %v477_v37 = vpack.c.bf16 %v471_v28, %v469_v32  ;;  %v461_v43 = vadd.f32 %v460_v29, %v382_v20  ;;  %v2680_v27 = vld [vmem:[#allocation5 + $0xd0] ss:$8 sps:$4 sm:$0xff]   ;;  %v2688_v29 = vld [vmem:[#allocation5 + $0xc4] ss:$8 sps:$4 sm:$0xff]  }
 0x127   : > { %v462_v33 = vpop.f32.mrf.mxu0  ;;  %v2683_v28 = vld [vmem:[#allocation5 + $0x1d0] ss:$8 sps:$4 sm:$0xff]   ;;  %v2689_v32 = vld [vmem:[#allocation5 + $0x1c0] ss:$8 sps:$4 sm:$0xff]  }
 0x128   : > { %v478_v34 = vpack.c.bf16 %v472_v31, %v470_v30  ;;  %v463_v41 = vadd.f32 %v462_v33, %v386_v19  ;;  %v473_v53 = vmax.f32 %v461_v43, 0.0  ;;  %v2691_v30 = vld [vmem:[#allocation5 + $0x1c4] ss:$8 sps:$4 sm:$0xff]   ;;  %v2686_v31 = vld [vmem:[#allocation5 + $0xc0] ss:$8 sps:$4 sm:$0xff]  }
 0x129   : > { %v464_v38 = vpop.f32.mrf.mxu0  ;;  %v2694_v33 = vld [vmem:[#allocation5 + $0xb4] ss:$8 sps:$4 sm:$0xff]   ;;  %v2704_v43 = vld [vmem:[#allocation5 + $0x90] ss:$8 sps:$4 sm:$0xff]  }
 0x12a   : > { %v465_v42 = vadd.f32 %v464_v38, %v382_v20  ;;  %919 = vmatprep.mubr.bf16.mxu1 %v478_v34  ;;  %972 = vmatprep.mubr.bf16.mxu0 %v478_v34  ;;  %v474_v51 = vmax.f32 %v463_v41, 0.0  ;;  %v2671_v20 = vld [vmem:[#allocation5 + $0x1f0] ss:$8 sps:$4 sm:$0xff]   ;;  %v2697_v34 = vld [vmem:[#allocation5 + $0x1b4] ss:$8 sps:$4 sm:$0xff]  }
 0x12b   : > { %v466_v44 = vpop.f32.mrf.mxu0  ;;  %920 = vmatmul.mubr.bf16.vlgmr.msra.gmra.mxu1 %v477_v37  ;;  %973 = vmatmul.mubr.bf16.vlgmr.msra.gmra.mxu0 %v477_v37  ;;  %v2700_v37 = vld [vmem:[#allocation5 + $0xa4] ss:$8 sps:$4 sm:$0xff]   ;;  %v2706_v41 = vld [vmem:[#allocation5 + $0x94] ss:$8 sps:$4 sm:$0xff]  }
 0x12c   : > { %v467_v45 = vadd.f32 %v466_v44, %v386_v19  ;;  %1414 = vmatpush1.bf16.msra.mxu1 %v2620_v35  ;;  %1467 = vmatpush1.bf16.msra.mxu0 %v2623_v36  ;;  %v475_v48 = vmax.f32 %v465_v42, 0.0  ;;  %v2668_v19 = vld [vmem:[#allocation5 + $0xf0] ss:$8 sps:$4 sm:$0xff]   ;;  %v2703_v38 = vld [vmem:[#allocation5 + $0x1a4] ss:$8 sps:$4 sm:$0xff]  }
 0x12d   : > { %1415 = vmatprep.subr.bf16.mxu1 %v2628_v39  ;;  %1468 = vmatprep.subr.bf16.mxu0 %v2631_v40  ;;  %v2692_v35 = vld [vmem:[#allocation5 + $0xb0] ss:$8 sps:$4 sm:$0xff]   ;;  %v2698_v39 = vld [vmem:[#allocation5 + $0xa0] ss:$8 sps:$4 sm:$0xff]   ;;  %v2709_v42 = vld [vmem:[#allocation5 + $0x194] ss:$8 sps:$4 sm:$0xff]  }
 0x12e   : > { %v476_v52 = vmax.f32 %v467_v45, 0.0  ;;  %v479_v57 = vpack.c.bf16 %v475_v48, %v473_v53  ;;  %v2695_v36 = vld [vmem:[#allocation5 + $0x1b0] ss:$8 sps:$4 sm:$0xff]   ;;  %v2701_v40 = vld [vmem:[#allocation5 + $0x1a0] ss:$8 sps:$4 sm:$0xff]  }
 0x12f   : > { %v2707_v44 = vld [vmem:[#allocation5 + $0x190] ss:$8 sps:$4 sm:$0xff]   ;;  %v2712_v45 = vld [vmem:[#allocation5 + $0x84] ss:$8 sps:$4 sm:$0xff]   ;;  %v2713_v48 = vld [vmem:[#allocation5 + $0x180] ss:$8 sps:$4 sm:$0xff]  }
 0x130   : > { %v480_v54 = vpack.c.bf16 %v476_v52, %v474_v51  ;;  %1416 = vmatpush1.bf16.msra.mxu1 %v2626_v46  ;;  %1469 = vmatpush1.bf16.msra.mxu0 %v2629_v47  ;;  %v2715_v46 = vld [vmem:[#allocation5 + $0x184] ss:$8 sps:$4 sm:$0xff]   ;;  %v2710_v47 = vld [vmem:[#allocation5 + $0x80] ss:$8 sps:$4 sm:$0xff]   ;;  %v557_v51 = vsub.s32 2, %v3128_v14 }
 0x131   : > { %1417 = vmatprep.subr.bf16.mxu1 %v2634_v49  ;;  %1470 = vmatprep.subr.bf16.mxu0 %v2637_v50  ;;  %v2716_v49 = vld [vmem:[#allocation7 + $0x78] sm:$0xff]   ;;  %v561_v50 = vsub.s32 3, %v3128_v14  ;;  %v545_v52 = vld [vmem:[%s3242_s7 + $0x2] sm:$0xf] }
 0x132   : > { %929 = vmatprep.mubr.bf16.mxu1 %v480_v54  ;;  %982 = vmatprep.mubr.bf16.mxu0 %v480_v54 }
 0x133   : > { %930 = vmatmul.mubr.bf16.gmra.mxu1 %v479_v57  ;;  %983 = vmatmul.mubr.bf16.gmra.mxu0 %v479_v57  ;;  %v550_v57 = vrot.slane %v545_v52, %v3134_v16 }
 0x134   : > { %1418 = vmatpush1.bf16.msra.mxu1 %v2632_v55  ;;  %1471 = vmatpush1.bf16.msra.mxu0 %v2635_v56  ;;  %v554_v55 = vrot.slane %v545_v52, %v3131_v15  ;;  %v562_v56 = vrot.slane %v545_v52, %v561_v50 }
 0x135   : > { %1419 = vmatprep.subr.bf16.mxu1 %v2640_v58  ;;  %1472 = vmatprep.subr.bf16.mxu0 %v2643_v59  ;;  %v558_v58 = vrot.slane %v545_v52, %v557_v51 }
 0x138   : > { %1420 = vmatpush1.bf16.msra.mxu1 %v2638_v60  ;;  %1473 = vmatpush1.bf16.msra.mxu0 %v2641_v61 }
 0x139   : > { %1421 = vmatprep.subr.bf16.mxu1 %v2646_v62  ;;  %1474 = vmatprep.subr.bf16.mxu0 %v2649_v63 }
 0x13c   : > { %1422 = vmatpush1.bf16.msra.mxu1 %v2644_v0  ;;  %1475 = vmatpush1.bf16.msra.mxu0 %v2647_v1 }
 0x13d   : > { %1423 = vmatprep.subr.bf16.mxu1 %v2652_v2  ;;  %1476 = vmatprep.subr.bf16.mxu0 %v2655_v3 }
 0x140   : > { %1424 = vmatpush1.bf16.msra.mxu1 %v2650_v4  ;;  %1477 = vmatpush1.bf16.msra.mxu0 %v2653_v5 }
 0x141   : > { %1425 = vmatprep.subr.bf16.mxu1 %v2658_v6  ;;  %1478 = vmatprep.subr.bf16.mxu0 %v2661_v7 }
 0x144   : > { %1426 = vmatpush1.bf16.msra.mxu1 %v2656_v8  ;;  %1479 = vmatpush1.bf16.msra.mxu0 %v2659_v9 }
 0x145   : > { %1427 = vmatprep.subr.bf16.mxu1 %v2664_v10  ;;  %1480 = vmatprep.subr.bf16.mxu0 %v2667_v11 }
 0x148   : > { %1428 = vmatpush1.bf16.msra.mxu1 %v2662_v12  ;;  %1481 = vmatpush1.bf16.msra.mxu0 %v2665_v13 }
 0x149   : > { %1429 = vmatprep.subr.bf16.mxu1 %v2670_v17  ;;  %1482 = vmatprep.subr.bf16.mxu0 %v2673_v18 }
 0x14c   : > { %1430 = vmatpush2.bf16.msra.mxu1 %v2668_v19  ;;  %1483 = vmatpush2.bf16.msra.mxu0 %v2671_v20 }
 0x14d   : > { %1431 = vmatprep.subr.bf16.mxu1 %v2676_v21  ;;  %1484 = vmatprep.subr.bf16.mxu0 %v2679_v22 }
 0x150   : > { %1432 = vmatpush2.bf16.msra.mxu1 %v2674_v23  ;;  %1485 = vmatpush2.bf16.msra.mxu0 %v2677_v24 }
 0x151   : > { %1433 = vmatprep.subr.bf16.mxu1 %v2682_v25  ;;  %1486 = vmatprep.subr.bf16.mxu0 %v2685_v26  ;;  %v2717_v25 = vld [vmem:[#allocation7 + $0x38] sm:$0xff]  }
 0x154   : > { %1434 = vmatpush2.bf16.msra.mxu1 %v2680_v27  ;;  %1487 = vmatpush2.bf16.msra.mxu0 %v2683_v28 }
 0x155   : > { %1435 = vmatprep.subr.bf16.mxu1 %v2688_v29  ;;  %1488 = vmatprep.subr.bf16.mxu0 %v2691_v30 }
 0x158   : > { %1436 = vmatpush2.bf16.msra.mxu1 %v2686_v31  ;;  %1489 = vmatpush2.bf16.msra.mxu0 %v2689_v32  ;;  %v2718_v31 = vld [vmem:[#allocation7 + $0x70] sm:$0xff]  }
 0x159   : > { %1437 = vmatprep.subr.bf16.mxu1 %v2694_v33  ;;  %1490 = vmatprep.subr.bf16.mxu0 %v2697_v34 }
 0x15c   : > { %1438 = vmatpush2.bf16.msra.mxu1 %v2692_v35  ;;  %1491 = vmatpush2.bf16.msra.mxu0 %v2695_v36 }
 0x15d   : > { %1439 = vmatprep.subr.bf16.mxu1 %v2700_v37  ;;  %1492 = vmatprep.subr.bf16.mxu0 %v2703_v38 }
 0x160   : > { %1440 = vmatpush2.bf16.msra.mxu1 %v2698_v39  ;;  %1493 = vmatpush2.bf16.msra.mxu0 %v2701_v40 }
 0x161   : > { %1441 = vmatprep.subr.bf16.mxu1 %v2706_v41  ;;  %1494 = vmatprep.subr.bf16.mxu0 %v2709_v42  ;;  %v2719_v41 = vld [vmem:[#allocation7 + $0x30] sm:$0xff]  }
 0x164   : > { %1442 = vmatpush2.bf16.msra.mxu1 %v2704_v43  ;;  %1495 = vmatpush2.bf16.msra.mxu0 %v2707_v44  ;;  %v2720_v44 = vld [vmem:[#allocation7 + $0x68] sm:$0xff]  }
 0x165   : > { %1443 = vmatprep.subr.bf16.mxu1 %v2712_v45  ;;  %1496 = vmatprep.subr.bf16.mxu0 %v2715_v46 }
 0x168   : > { %1444 = vmatpush2.bf16.msra.mxu1 %v2710_v47  ;;  %1497 = vmatpush2.bf16.msra.mxu0 %v2713_v48 }
 0x169   : > { %2341 = vmatprep.subr.bf16.mxu1 %v2716_v49 }
 0x1eb   : > { %v921_v53 = vpop.f32.mrf.mxu1  ;;  %v974_v54 = vpop.f32.mrf.mxu0 }
 0x1ec   : > { %v922_v2 = vadd.f32 %v921_v53, %v550_v57  ;;  %v975_v3 = vadd.f32 %v974_v54, %v558_v58  ;;  %v2721_v53 = vld [vmem:[#allocation7 + $0x28] sm:$0xff]  }
 0x1ed   : > { %v923_v59 = vpop.f32.mrf.mxu1  ;;  %v976_v60 = vpop.f32.mrf.mxu0 }
 0x1ee   : > { %v924_v63 = vadd.f32 %v923_v59, %v554_v55  ;;  %v977_v0 = vadd.f32 %v976_v60, %v562_v56  ;;  %v993_v19 = vmax.f32 %v922_v2, 0.0  ;;  %v995_v20 = vmax.f32 %v975_v3, 0.0  ;;  %v2725_v59 = vld [vmem:[#allocation7 + $0x18] sm:$0xff]   ;;  %v2726_v60 = vld [vmem:[#allocation7 + $0x50] sm:$0xff]   ;;  %v2734_v3 = vld [vmem:[%s3240_s5 + $0x28] sm:$0xff]  }
 0x1ef   : > { %v925_v61 = vpop.f32.mrf.mxu1  ;;  %v978_v62 = vpop.f32.mrf.mxu0  ;;  %v2733_v2 = vld [vmem:[%s3240_s5 + $0x30] sm:$0xff]  }
 0x1f0   : > { %v926_v1 = vadd.f32 %v925_v61, %v550_v57  ;;  %v979_v14 = vadd.f32 %v978_v62, %v558_v58  ;;  %v994_v12 = vmax.f32 %v924_v63, 0.0  ;;  %v996_v13 = vmax.f32 %v977_v0, 0.0  ;;  %v2727_v61 = vld [vmem:[#allocation7 + $0x10] sm:$0xff]   ;;  %v2728_v62 = vld [vmem:[#allocation7 + $0x48] sm:$0xff]   ;;  %v2730_v0 = vld [vmem:[#allocation7 + $0x40] sm:$0xff]  }
 0x1f1   : > { %v927_v4 = vpop.f32.mrf.mxu1  ;;  %v980_v5 = vpop.f32.mrf.mxu0  ;;  %v2729_v63 = vld [vmem:[#allocation7 + $0x8] sm:$0xff]  }
 0x1f2   : > { %v928_v6 = vadd.f32 %v927_v4, %v554_v55  ;;  %v981_v7 = vadd.f32 %v980_v5, %v562_v56  ;;  %v997_v8 = vmax.f32 %v926_v1, 0.0  ;;  %v999_v9 = vmax.f32 %v979_v14, 0.0  ;;  %v2731_v1 = vld [vmem:[#allocation7] sm:$0xff]   ;;  %v2732_v14 = vld [vmem:[%s3240_s5 + $0x38] sm:$0xff]  }
 0x1f3   : > { %v931_v10 = vpop.f32.mrf.mxu1  ;;  %v984_v11 = vpop.f32.mrf.mxu0  ;;  %2389 = vmatprep.subr.bf16.mxu0 %v2732_v14  ;;  %v1081_v4 = vld [vmem:[%s3242_s7 + $0x6] sm:$0x3] }
 0x1f4   : > { %v998_v17 = vmax.f32 %v928_v6, 0.0  ;;  %v1000_v18 = vmax.f32 %v981_v7, 0.0  ;;  %v1009_v26 = vpack.c.bf16 %v997_v8, %v993_v19  ;;  %v1011_v27 = vpack.c.bf16 %v999_v9, %v995_v20 }
 0x1f5   : > { %v933_v21 = vpop.f32.mrf.mxu1  ;;  %v986_v22 = vpop.f32.mrf.mxu0  ;;  %v932_v35 = vadd.f32 %v931_v10, %v550_v57  ;;  %v985_v36 = vadd.f32 %v984_v11, %v558_v58  ;;  %v1090_v5 = vrot.slane %v1081_v4, %v3131_v15  ;;  %v1086_v6 = vrot.slane %v1081_v4, %v3134_v16 }
 0x1f6   : > { %v1010_v23 = vpack.c.bf16 %v998_v17, %v994_v12  ;;  %v1012_v24 = vpack.c.bf16 %v1000_v18, %v996_v13  ;;  %v934_v28 = vadd.f32 %v933_v21, %v554_v55  ;;  %v987_v32 = vadd.f32 %v986_v22, %v562_v56 }
 0x1f7   : > { %v935_v29 = vpop.f32.mrf.mxu1  ;;  %v988_v30 = vpop.f32.mrf.mxu0  ;;  %v1001_v49 = vmax.f32 %v932_v35, 0.0  ;;  %v1003_v50 = vmax.f32 %v985_v36, 0.0 }
 0x1f8   : > { %v936_v33 = vadd.f32 %v935_v29, %v550_v57  ;;  %v989_v34 = vadd.f32 %v988_v30, %v558_v58  ;;  %1445 = vmatprep.mubr.bf16.mxu1 %v1010_v23  ;;  %1498 = vmatprep.mubr.bf16.mxu0 %v1012_v24  ;;  %v1002_v45 = vmax.f32 %v934_v28, 0.0  ;;  %v1004_v46 = vmax.f32 %v987_v32, 0.0  ;;  %v2724_v58 = vld [vmem:[#allocation7 + $0x58] sm:$0xff]  }
 0x1f9   : > { %v937_v37 = vpop.f32.mrf.mxu1  ;;  %v990_v38 = vpop.f32.mrf.mxu0  ;;  %1446 = vmatmul.mubr.bf16.vlgmr.msra.gmra.mxu1 %v1009_v26  ;;  %1499 = vmatmul.mubr.bf16.vlgmr.msra.gmra.mxu0 %v1011_v27 }
 0x1fa   : > { %v938_v39 = vadd.f32 %v937_v37, %v554_v55  ;;  %v991_v40 = vadd.f32 %v990_v38, %v562_v56  ;;  %2342 = vmatpush3.bf16.msra.mxu1 %v2717_v25  ;;  %v1005_v42 = vmax.f32 %v936_v33, 0.0  ;;  %v1007_v43 = vmax.f32 %v989_v34, 0.0  ;;  %v2722_v55 = vld [vmem:[#allocation7 + $0x60] sm:$0xff]   ;;  %2390 = vmatpush3.bf16.msra.mxu0 %v2732_v14 }
 0x1fb   : > { %2343 = vmatprep.subr.bf16.mxu1 %v2718_v31  ;;  %v2723_v56 = vld [vmem:[#allocation7 + $0x20] sm:$0xff]   ;;  %2391 = vmatprep.subr.bf16.mxu0 %v2733_v2 }
 0x1fc   : > { %v1006_v47 = vmax.f32 %v938_v39, 0.0  ;;  %v1008_v48 = vmax.f32 %v991_v40, 0.0  ;;  %v1013_v54 = vpack.c.bf16 %v1005_v42, %v1001_v49  ;;  %v1015_v57 = vpack.c.bf16 %v1007_v43, %v1003_v50 }
 0x1fe   : > { %v1014_v51 = vpack.c.bf16 %v1006_v47, %v1002_v45  ;;  %v1016_v52 = vpack.c.bf16 %v1008_v48, %v1004_v46  ;;  %2344 = vmatpush3.bf16.msra.mxu1 %v2719_v41  ;;  %2392 = vmatpush3.bf16.msra.mxu0 %v2733_v2 }
 0x1ff   : > { %2345 = vmatprep.subr.bf16.mxu1 %v2720_v44  ;;  %2393 = vmatprep.subr.bf16.mxu0 %v2734_v3 }
 0x200   : > { %1455 = vmatprep.mubr.bf16.mxu1 %v1014_v51  ;;  %1508 = vmatprep.mubr.bf16.mxu0 %v1016_v52  ;;  %v2735_v52 = vld [vmem:[%s3240_s5 + $0x20] sm:$0xff]  }
 0x201   : > { %1456 = vmatmul.mubr.bf16.gmra.mxu1 %v1013_v54  ;;  %1509 = vmatmul.mubr.bf16.gmra.mxu0 %v1015_v57  ;;  %v2737_v54 = vld [vmem:[%s3240_s5 + $0x10] sm:$0xff]   ;;  %v2738_v57 = vld [vmem:[%s3240_s5 + $0x8] sm:$0xff]  }
 0x202   : > { %2346 = vmatpush3.bf16.msra.mxu1 %v2721_v53  ;;  %2394 = vmatpush3.bf16.msra.mxu0 %v2734_v3  ;;  %v2736_v53 = vld [vmem:[%s3240_s5 + $0x18] sm:$0xff]  }
 0x203   : > { %2347 = vmatprep.subr.bf16.mxu1 %v2722_v55  ;;  %2395 = vmatprep.subr.bf16.mxu0 %v2735_v52  ;;  %v2739_v55 = vld [vmem:[%s3240_s5] sm:$0xff]  }
 0x206   : > { %2348 = vmatpush3.bf16.msra.mxu1 %v2723_v56  ;;  %2396 = vmatpush3.bf16.msra.mxu0 %v2735_v52  ;;  %v2740_v56 = vld [vmem:[#allocation8 + $0x38] sm:$0xff]  }
 0x207   : > { %2349 = vmatprep.subr.bf16.mxu1 %v2724_v58  ;;  %2397 = vmatprep.subr.bf16.mxu0 %v2736_v53  ;;  %v2741_v58 = vld [vmem:[#allocation8 + $0x30] sm:$0xff]  }
 0x20a   : > { %2350 = vmatpush3.bf16.msra.mxu1 %v2725_v59  ;;  %2398 = vmatpush3.bf16.msra.mxu0 %v2736_v53  ;;  %v2742_v59 = vld [vmem:[#allocation8 + $0x28] sm:$0xff]  }
 0x20b   : > { %2351 = vmatprep.subr.bf16.mxu1 %v2726_v60  ;;  %2399 = vmatprep.subr.bf16.mxu0 %v2737_v54  ;;  %v2743_v60 = vld [vmem:[#allocation8 + $0x20] sm:$0xff]  }
 0x20e   : > { %2352 = vmatpush3.bf16.msra.mxu1 %v2727_v61  ;;  %2400 = vmatpush3.bf16.msra.mxu0 %v2737_v54  ;;  %v2744_v61 = vld [vmem:[#allocation8 + $0x18] sm:$0xff]  }
 0x20f   : > { %2353 = vmatprep.subr.bf16.mxu1 %v2728_v62  ;;  %2401 = vmatprep.subr.bf16.mxu0 %v2738_v57 }
 0x212   : > { %2354 = vmatpush3.bf16.msra.mxu1 %v2729_v63  ;;  %2402 = vmatpush3.bf16.msra.mxu0 %v2738_v57 }
 0x213   : > { %2355 = vmatprep.subr.bf16.mxu1 %v2730_v0  ;;  %2403 = vmatprep.subr.bf16.mxu0 %v2739_v55 }
 0x216   : > { %2356 = vmatpush3.bf16.msra.mxu1 %v2731_v1  ;;  %2404 = vmatpush3.bf16.msra.mxu0 %v2739_v55  ;;  %v2277_v1 = vld [vmem:[%s3242_s7 + $0x8] ss:$0 sm:$0xff] }
 0x217   : > { %2409 = vmatprep.subr.bf16.mxu1 %v2740_v56 }
 0x2b9   : > { %v1447_v7 = vpop.f32.mrf.mxu1  ;;  %v1500_v8 = vpop.f32.mrf.mxu0 }
 0x2ba   : > { %v1448_v12 = vadd.f32 %v1447_v7, %v1086_v6 }
 0x2bb   : > { %v1449_v9 = vpop.f32.mrf.mxu1  ;;  %v1502_v10 = vpop.f32.mrf.mxu0 }
 0x2bc   : > { %v1450_v11 = vadd.f32 %v1449_v9, %v1090_v5  ;;  %v1501_v24 = vadd.f32 %v1500_v8, %v1448_v12 }
 0x2bd   : > { %v1451_v13 = vpop.f32.mrf.mxu1  ;;  %v1504_v17 = vpop.f32.mrf.mxu0 }
 0x2be   : > { %v1452_v18 = vadd.f32 %v1451_v13, %v1086_v6  ;;  %v1503_v21 = vadd.f32 %v1502_v10, %v1450_v11  ;;  %v1519_v32 = vmax.f32 %v1501_v24, 0.0  ;;  %v2746_v24 = vld [vmem:[#allocation8 + $0x8] sm:$0xff]  }
 0x2bf   : > { %v1453_v19 = vpop.f32.mrf.mxu1  ;;  %v1506_v20 = vpop.f32.mrf.mxu0 }
 0x2c0   : > { %v1505_v22 = vadd.f32 %v1504_v17, %v1452_v18  ;;  %v1454_v23 = vadd.f32 %v1453_v19, %v1090_v5  ;;  %v1520_v29 = vmax.f32 %v1503_v21, 0.0 }
 0x2c1   : > { %v1457_v25 = vpop.f32.mrf.mxu1  ;;  %v1510_v26 = vpop.f32.mrf.mxu0 }
 0x2c2   : > { %v1507_v15 = vadd.f32 %v1506_v20, %v1454_v23  ;;  %v1521_v27 = vmax.f32 %v1505_v22, 0.0  ;;  %v1458_v33 = vadd.f32 %v1457_v25, %v1086_v6  ;;  %v2745_v23 = vld [vmem:[#allocation8 + $0x10] sm:$0xff]   ;;  %v2747_v25 = vld [vmem:[#allocation8] sm:$0xff]  }
 0x2c3   : > { %v1459_v16 = vpop.f32.mrf.mxu1  ;;  %v1512_v28 = vpop.f32.mrf.mxu0 }
 0x2c4   : > { %v1522_v30 = vmax.f32 %v1507_v15, 0.0  ;;  %v1460_v31 = vadd.f32 %v1459_v16, %v1090_v5  ;;  %v1527_v38 = vpack.c.bf16 %v1521_v27, %v1519_v32  ;;  %v1511_v43 = vadd.f32 %v1510_v26, %v1458_v33  ;;  %v2294_v27 = vld [vmem:[%s3242_s7 + $0x9] ss:$0 sm:$0xff] }
 0x2c5   : > { %v1461_v34 = vpop.f32.mrf.mxu1  ;;  %v1514_v35 = vpop.f32.mrf.mxu0 }
 0x2c6   : > { %v1528_v36 = vpack.c.bf16 %v1522_v30, %v1520_v29  ;;  %v1462_v37 = vadd.f32 %v1461_v34, %v1086_v6  ;;  %v1513_v40 = vadd.f32 %v1512_v28, %v1460_v31  ;;  %v1523_v49 = vmax.f32 %v1511_v43, 0.0 }
 0x2c7   : > { %v1463_v39 = vpop.f32.mrf.mxu1  ;;  %v1516_v44 = vpop.f32.mrf.mxu0 }
 0x2c8   : > { %v1515_v41 = vadd.f32 %v1514_v35, %v1462_v37  ;;  %v1464_v42 = vadd.f32 %v1463_v39, %v1090_v5  ;;  %1698 = vmatprep.mubr.bf16.mxu1 %v1528_v36  ;;  %v1524_v47 = vmax.f32 %v1513_v40, 0.0  ;;  %v2303_v39 = vld [vmem:[%s3242_s7 + $0xa] ss:$0 sm:$0xff] }
 0x2c9   : > { %1699 = vmatmul.mubr.bf16.vlgmr.msra.gmra.mxu1 %v1527_v38 }
 0x2ca   : > { %v1517_v45 = vadd.f32 %v1516_v44, %v1464_v42  ;;  %v1525_v46 = vmax.f32 %v1515_v41, 0.0  ;;  %2410 = vmatpush3.bf16.msra.mxu1 %v2740_v56 }
 0x2cb   : > { %2411 = vmatprep.subr.bf16.mxu1 %v2741_v58 }
 0x2cc   : > { %v1526_v48 = vmax.f32 %v1517_v45, 0.0  ;;  %v1529_v51 = vpack.c.bf16 %v1525_v46, %v1523_v49 }
 0x2ce   : > { %v1530_v50 = vpack.c.bf16 %v1526_v48, %v1524_v47  ;;  %2412 = vmatpush3.bf16.msra.mxu1 %v2741_v58 }
 0x2cf   : > { %2413 = vmatprep.subr.bf16.mxu1 %v2742_v59 }
 0x2d0   : > { %1706 = vmatprep.mubr.bf16.mxu1 %v1530_v50 }
 0x2d1   : > { %1707 = vmatmul.mubr.bf16.gmra.mxu1 %v1529_v51 }
 0x2d2   : > { %2414 = vmatpush3.bf16.msra.mxu1 %v2742_v59 }
 0x2d3   : > { %2415 = vmatprep.subr.bf16.mxu1 %v2743_v60 }
 0x2d6   : > { %2416 = vmatpush3.bf16.msra.mxu1 %v2743_v60 }
 0x2d7   : > { %2417 = vmatprep.subr.bf16.mxu1 %v2744_v61 }
 0x2da   : > { %2418 = vmatpush3.bf16.msra.mxu1 %v2744_v61 }
 0x2db   : > { %2419 = vmatprep.subr.bf16.mxu1 %v2745_v23 }
 0x2de   : > { %2420 = vmatpush3.bf16.msra.mxu1 %v2745_v23 }
 0x2df   : > { %2421 = vmatprep.subr.bf16.mxu1 %v2746_v24 }
 0x2e2   : > { %2422 = vmatpush3.bf16.msra.mxu1 %v2746_v24 }
 0x2e3   : > { %2423 = vmatprep.subr.bf16.mxu1 %v2747_v25 }
 0x2e6   : > { %2424 = vmatpush3.bf16.msra.mxu1 %v2747_v25 }
 0x389   : > { %v2357_v62 = vpop.f32.mrf.mxu1 }
 0x38b   : > { %v2358_v63 = vpop.f32.mrf.mxu1 }
 0x38c   : > { %v2359_v0 = vadd.f32 %v2358_v63, %v2357_v62 }
 0x38d   : > { %v2360_v14 = vpop.f32.mrf.mxu1 }
 0x38e   : > { %v1701_v3 = vadd.f32 %v2359_v0, %v2277_v1 }
 0x38f   : > { %v2361_v2 = vpop.f32.mrf.mxu1 }
 0x390   : > { %v2362_v4 = vadd.f32 %v2361_v2, %v2360_v14  ;;  %v1715_v8 = vmax.f32 %v1701_v3, 0.0 }
 0x391   : > { %v2363_v5 = vpop.f32.mrf.mxu1 }
 0x392   : > { %v1704_v6 = vadd.f32 %v2362_v4, %v2277_v1 }
 0x393   : > { %v2364_v7 = vpop.f32.mrf.mxu1 }
 0x394   : > { %v1716_v9 = vmax.f32 %v1704_v6, 0.0  ;;  %v2365_v10 = vadd.f32 %v2364_v7, %v2363_v5 }
 0x395   : > { %v2366_v11 = vpop.f32.mrf.mxu1 }
 0x396   : > { %v1719_v12 = vpack.c.bf16 %v1716_v9, %v1715_v8  ;;  %v1709_v17 = vadd.f32 %v2365_v10, %v2277_v1 }
 0x397   : > { %v2367_v13 = vpop.f32.mrf.mxu1 }
 0x398   : > { %v2368_v18 = vadd.f32 %v2367_v13, %v2366_v11  ;;  %2405 = vmatprep.mubr.bf16.mxu0 %v1719_v12  ;;  %v1717_v20 = vmax.f32 %v1709_v17, 0.0 }
 0x39a   : > { %v1712_v19 = vadd.f32 %v2368_v18, %v2277_v1 }
 0x39c   : > { %v1718_v21 = vmax.f32 %v1712_v19, 0.0 }
 0x39e   : > { %v1720_v22 = vpack.c.bf16 %v1718_v21, %v1717_v20 }
 0x3a0   : > { %2406 = vmatmul.mubr.bf16.vlgmr.msra.gmra.mxu0 %v1720_v22 }
 0x460   : > { %v2407_v26 = vpop.f32.mrf.mxu0 }
 0x461   : > { %v1835_v30 = vadd.f32 %v2407_v26, %v2294_v27 }
 0x462   : > { %v1826_v15 = vpop.f32.mrf.mxu0 }
 0x463   : > { %v1827_v28 = vadd.f32 %v2294_v27, %v1826_v15  ;;  %v1843_v36 = vmax.f32 %v1835_v30, 0.0 }
 0x464   : > { %v2408_v16 = vpop.f32.mrf.mxu0 }
 0x465   : > { %v1838_v29 = vadd.f32 %v2408_v16, %v2294_v27  ;;  %v1841_v34 = vmax.f32 %v1827_v28, 0.0 }
 0x466   : > { %v1829_v31 = vpop.f32.mrf.mxu0 }
 0x467   : > { %v1830_v32 = vadd.f32 %v2294_v27, %v1829_v31  ;;  %v1844_v33 = vmax.f32 %v1838_v29, 0.0 }
 0x469   : > { %v1842_v35 = vmax.f32 %v1830_v32, 0.0  ;;  %v1846_v38 = vpack.c.bf16 %v1844_v33, %v1843_v36 }
 0x46b   : > { %v1845_v37 = vpack.c.bf16 %v1842_v35, %v1841_v34 }
 0x46d   : > { %2425 = vmatprep.mubr.bf16.mxu1 %v1845_v37 }
 0x46e   : > { %2426 = vmatmul.mubr.bf16.vlgmr.msra.gmra.mxu1 %v1846_v38 }
 0x52e   : > { %v2427_v40 = vpop.f32.mrf.mxu1 }
 0x52f   : > { %v1961_v41 = vadd.f32 %v2427_v40, %v2303_v39 }
 0x530   : > { %v1952_v42 = vpop.f32.mrf.mxu1 }
 0x531   : > { %v2314_v43 = vmul.f32 -1.442695, %v1961_v41  ;;  %v1953_v44 = vadd.f32 %v2303_v39, %v1952_v42 }
 0x532   : > { %v2428_v45 = vpop.f32.mrf.mxu1 }
 0x533   : > { %2748 = vpow2.f32 %v2314_v43  ;;  %v2312_v46 = vmul.f32 -1.442695, %v1953_v44  ;;  %v1964_v47 = vadd.f32 %v2428_v45, %v2303_v39 }
 0x534   : > { %v1955_v48 = vpop.f32.mrf.mxu1 }
 0x535   : > { %2750 = vpow2.f32 %v2312_v46  ;;  %v2315_v49 = vmul.f32 -1.442695, %v1964_v47  ;;  %v1956_v50 = vadd.f32 %v2303_v39, %v1955_v48 }
 0x537   : > { %2752 = vpow2.f32 %v2315_v49  ;;  %v2313_v51 = vmul.f32 -1.442695, %v1956_v50 }
 0x539   : > { %2754 = vpow2.f32 %v2313_v51 }
 0x540   : > { %v2749_v52 = vpop.eup %2748 }
 0x541   : > { %v1981_v54 = vadd.f32 1.0, %v2749_v52 }
 0x542   : > { %v2751_v53 = vpop.eup %2750 }
 0x543   : > { %v1979_v55 = vadd.f32 1.0, %v2751_v53  ;;  %2756 = vrcp.f32 %v1981_v54 }
 0x544   : > { %v2753_v57 = vpop.eup %2752 }
 0x545   : > { %v1982_v56 = vadd.f32 1.0, %v2753_v57 }
 0x546   : > { %v2755_v58 = vpop.eup %2754 }
 0x547   : > { %2758 = vrcp.f32 %v1982_v56  ;;  %v1980_v59 = vadd.f32 1.0, %v2755_v58 }
 0x548   : > { %2760 = vrcp.f32 %v1979_v55 }
 0x549   : > { %2762 = vrcp.f32 %v1980_v59 }
 0x550   : > { %v2757_v60 = vpop.eup %2756 }
 0x554   : > { %v2759_v61 = vpop.eup %2758 }
 0x555   : > { %v2761_v62 = vpop.eup %2760  ;;  %v2338_v63 = vpack.c.bf16 %v2759_v61, %v2757_v60 }
 0x556   : > { %v2763_v0 = vpop.eup %2762 }
 0x557   : > { %v2333_v1 = vpack.c.bf16 %v2763_v0, %v2761_v62  ;;  %2340 = vst [vmem:[%s358_s10 + $0x8] sm:$0xff] %v2338_v63  }
 0x559   : > { %2334 = vst [vmem:[%s358_s10] sm:$0xff] %v2333_v1  }
 0x55a   : > { %2881 = shalt.err (!%p2878_p8)
}
 0x55b   : > { %s2882_s20 = scalar_lea.hbm %s3191_s18, 256  ;;  %s2886_s26 = scalar_lea.hbm %s3243_s8, 512 }
 0x55c   : > { %p2883_p13 = scmp.ne.s32.totalorder %s3191_s18, %s2882_s20  ;;  %p2887_p1 = scmp.lt.s32.totalorder %s3191_s18, %s3243_s8 }
 0x55d   : > { %p2888_p12 = scmp.lt.s32.totalorder %s2886_s26, %s2882_s20 }
 0x55e   : > { %p2884_p11 = pnand %p2883_p13, %p3039_p5 }
 0x55f   : > { %p2889_p10 = por %p2888_p12, %p2887_p1 }
 0x560   : > { %p2885_p0 = pneg %p2884_p11 }
 0x562   : > { %p2890_p3 = pnand %p2889_p10, %p2885_p0 }
 0x564   : > { %2893 = shalt.err (!%p2890_p3)
}
 0x565   : > { %s2954_s13 = smov 64   ;;  %s2955_s21 = smov 4  }
 0x566   : > { %2445 = dma.vmem_to_hbm [thread:$0]  (%p3039_p5), %s3193_s22, 256, %s3191_s18, %s3195_s9, %s2954_s13, %s2954_s13, %s2955_s21  }
 0x567 PF: > { %p2472_p2 = scmp.ge.s32.totalorder %s2940_s30, 2  ;;  %s2040_s23 = sand.u32 1, %s2928_s27  }
 0x568   : > { %p3255_p4 = scmp.ne.s32.totalorder %s3246_s16, 0  ;;  %s2041_s19 = scalar_lea.sflag [#allocation4], %s2040_s23 }
 0x56a   : > { %p2461_p7 = pnand %p2472_p2, %p3255_p4 }
 0x56c   : > { %p2462_p6 = pneg %p2461_p7 }
 0x56e   : > { %2923 = dma.done.wait (%p2462_p6), %s2041_s19, 256  }
 0x56f   : > { %2925 = vsyncadd (%p2462_p6), %s2041_s19, 4294967040  ;;  %p21_p9 = scmp.ge.s32.totalorder %s3026_s11, 4   ;;  %s3256_s27 = smov %s2932_s28 }
 0x570   : > { %s3257_s28 = smov %s2936_s29  ;;  %s3258_s29 = smov %s3037_s14 }
 0x571   : > { %s3259_s30 = smov %s3026_s11  ;;  %23 = sbr.rel (!%p21_p9) target bundleno = 6 (0x6), region = 104 }
 0x576   :  { %2046 = vsyncpa [#allocation3], 1 }
 0x577   :  { %2048 = vsyncpa [#allocation3 + $0x1], 1 }
 0x578   :  { %2049 = vsyncpa [#allocation6], 1 }
 0x579   :  { %2050 = vsyncpa [#allocation9], 1 }
 0x57a   :  { %2051 = vsyncpa [#allocation4], 1 }
 0x57b   :  { %2053 = vsyncpa [#allocation4 + $0x1], 1 }

</bundles_post_ra>
